<compile_context>
chip_gen: v7x
topology: tpu7x:2x2x1
jax: 0.10.0
libtpu: 0.0.40
codegen_flags: <defaults>
</compile_context>

<pallas_src>
import jax
import jax.numpy as jnp
from jax.experimental import pallas as pl
from jax.experimental.pallas import tpu as pltpu

EPS = 1e-5


def _build_conv_matrix(w9, W, C):
    """(9, Cin, Cout) weights -> (3*W*C, W*C) im2col weight matrix.

    Row blocks are ordered dy = -1, 0, +1.  Inside a block,
    Wbig[w_in*C + cin, w_out*C + cout] is the tap weight for horizontal offset
    dx = w_in - w_out (zero outside [-1, 1] / outside the image, which
    implements the width-direction 'SAME' zero padding).
    """
    blocks = []
    for dy in (-1, 0, 1):
        big = jnp.zeros((W * C, W * C), jnp.float32)
        for dx in (-1, 0, 1):
            k = (dy + 1) * 3 + (dx + 1)
            big = big + jnp.kron(jnp.eye(W, k=-dx, dtype=jnp.float32), w9[k])
        blocks.append(big)
    return jnp.concatenate(blocks, axis=0)            # (3*W*C, W*C)


@jax.jit
def res_encoder(x_nhwc, w1, w2, g1, b1, g2, b2):
    """x_nhwc: (N,H,W,C) f32; w*: (9,Cin,Cout) f32; g*/b*: (1,C) f32."""
    N, H, W, C = x_nhwc.shape
    NH, WC = N * H, W * C
    inv_count = 1.0 / float(N * H * W)
    # The lane roll-and-add channel fold needs W to be a power of two.
    assert W > 0 and (W & (W - 1)) == 0, "W must be a power of two"
    n_fold_steps = W.bit_length() - 1                 # log2(W)

    # One-time (per compile, under jit) weight / constant repacks.
    x2 = x_nhwc.reshape(NH, WC)                       # lane-dense activation view
    wpack = jnp.stack([_build_conv_matrix(w1, W, C),
                       _build_conv_matrix(w2, W, C)], axis=0)   # (2, 3*WC, WC)
    gb = jnp.concatenate([jnp.tile(g1.reshape(1, C), (1, W)),
                          jnp.tile(b1.reshape(1, C), (1, W)),
                          jnp.tile(g2.reshape(1, C), (1, W)),
                          jnp.tile(b2.reshape(1, C), (1, W))], axis=0)  # (4, WC)
    # TODO(synk): at realistic W*C the dense (3*WC, WC) weight stacks are
    # quadratic (and blow past v7x's 64 MiB VMEM); switch dx handling to lane
    # rolls + block-diagonal per-tap weights (O(W*C^2)), bf16 the stacks, or
    # K-tile with a grid axis before scaling up.

    def kernel(x_ref, w_ref, gb_ref, out_ref):
        x = x_ref[...]                                # (NH, WC), DMA'd once

        # Height-direction 'SAME' padding masks: rows with h==0 have no
        # up-neighbour, rows with h==H-1 have no down-neighbour (covers the
        # image boundaries inside the packed NH axis, including n boundaries
        # and the cyclic wrap rows of the rolls below).
        row_in_img = jax.lax.broadcasted_iota(jnp.int32, (NH, 1), 0) % H
        has_up = row_in_img > 0
        has_dn = row_in_img < (H - 1)

        def conv3x3(h, w):
            # Height taps via cyclic sublane rolls (XLU) + boundary masks
            # (VPU) -- co-issuable with MXU work, no tiny shift matmuls.
            up = jnp.where(has_up, pltpu.roll(h, shift=1, axis=0), 0.0)
            dn = jnp.where(has_dn, pltpu.roll(h, shift=NH - 1, axis=0), 0.0)
            # TODO(synk): on v7x (MRB accumulation) replace concat + fat
            # matmul with three accumulated matmuls against 128-row slices of
            # w to skip materializing the patches tensor; keep the single fat
            # matmul on v5e/v6e (MRF).
            patches = jnp.concatenate([up, h, dn], axis=1)       # (NH, 3*WC)
            return jnp.dot(patches, w,
                           preferred_element_type=jnp.float32)   # (NH, WC)

        def batchnorm(y, gt, bt):
            # Single-pass training-mode BN over (N,H,W), biased variance.
            # NOTE: E[y^2]-mean^2 is cancellation-prone when |mean| >> std;
            # fine at this scale / tolerance.
            s1 = jnp.sum(y, axis=0, keepdims=True)               # (1, WC)
            s2 = jnp.sum(y * y, axis=0, keepdims=True)           # (1, WC)
            stats = jnp.concatenate([s1, s2], axis=0)            # (2, WC)
            # Channel fold across the W lane groups: log2(W)-step cyclic
            # lane roll-and-add tree (replaces the (2,WC)@(WC,WC) matmul).
            for k in range(n_fold_steps):
                stats = stats + pltpu.roll(stats, shift=C * (1 << k), axis=1)
            folded = stats * inv_count
            mean = folded[0:1, :]                                # E[y] per chan
            var = folded[1:2, :] - mean * mean                   # E[y^2]-E[y]^2
            inv = jax.lax.rsqrt(var + EPS)
            return (y - mean) * (inv * gt) + bt

        gb_all = gb_ref[...]
        h1 = conv3x3(x, w_ref[0])
        h1 = jnp.maximum(batchnorm(h1, gb_all[0:1], gb_all[1:2]), 0.0)
        h2 = batchnorm(conv3x3(h1, w_ref[1]), gb_all[2:3], gb_all[3:4])
        out_ref[...] = jnp.maximum(h2 + x, 0.0)       # residual add + ReLU

    # TODO(synk): on v7x, add a leading "parallel" grid axis over row blocks
    # (two TensorCores) with two-phase BN partial-stat accumulation, and row-
    # tile with a halo once shapes outgrow VMEM; at this toy size the whole
    # problem fits one core so the kernel stays grid-less.
    vmem = pl.BlockSpec(memory_space=pltpu.MemorySpace.VMEM)
    out2 = pl.pallas_call(
        kernel,
        out_shape=jax.ShapeDtypeStruct((NH, WC), jnp.float32),
        in_specs=[vmem, vmem, vmem],
        out_specs=vmem,
    )(x2, wpack, gb)
    return out2.reshape(N, H, W, C)


def res_encoder_ref(x_nhwc, w1, w2, g1, b1, g2, b2):
    """Pure-JAX reference (same NHWC/HWIO conventions, training-mode BN)."""
    C = x_nhwc.shape[-1]
    w1_hwio = w1.reshape(3, 3, C, C)
    w2_hwio = w2.reshape(3, 3, C, C)
    dn = jax.lax.conv_dimension_numbers(x_nhwc.shape, w1_hwio.shape,
                                        ('NHWC', 'HWIO', 'NHWC'))

    def conv(x, w):
        return jax.lax.conv_general_dilated(x, w, (1, 1), 'SAME',
                                            dimension_numbers=dn)

    def bn(y, g, b):
        mean = y.mean(axis=(0, 1, 2), keepdims=True)
        var = ((y - mean) ** 2).mean(axis=(0, 1, 2), keepdims=True)
        return (y - mean) * jax.lax.rsqrt(var + EPS) * g.reshape(1, 1, 1, C) \
            + b.reshape(1, 1, 1, C)

    h = jnp.maximum(bn(conv(x_nhwc, w1_hwio), g1, b1), 0.0)
    h2 = bn(conv(h, w2_hwio), g2, b2)
    return jnp.maximum(h2 + x_nhwc, 0.0)


if __name__ == "__main__":
    # ResEncoder(in_features=C, out_features=C, stride=1, downsample=None)
    N, H, W, C = 2, 16, 16, 8          # W*C = 128 -> exactly one lane row

    key = jax.random.PRNGKey(0)
    kx, kw1, kw2, kg1, kb1, kg2, kb2 = jax.random.split(key, 7)

    x = jax.random.normal(kx, (N, H, W, C), dtype=jnp.float32)
    w1 = 0.1 * jax.random.normal(kw1, (9, C, C), dtype=jnp.float32)
    w2 = 0.1 * jax.random.normal(kw2, (9, C, C), dtype=jnp.float32)
    g1 = 1.0 + 0.1 * jax.random.normal(kg1, (1, C), dtype=jnp.float32)
    b1 = 0.1 * jax.random.normal(kb1, (1, C), dtype=jnp.float32)
    g2 = 1.0 + 0.1 * jax.random.normal(kg2, (1, C), dtype=jnp.float32)
    b2 = 0.1 * jax.random.normal(kb2, (1, C), dtype=jnp.float32)

    out = jax.block_until_ready(res_encoder(x, w1, w2, g1, b1, g2, b2))
    ref = jax.block_until_ready(res_encoder_ref(x, w1, w2, g1, b1, g2, b2))

    assert out.shape == (N, H, W, C)
    err = float(jnp.max(jnp.abs(out - ref)))
    assert jnp.allclose(out, ref, atol=2e-4, rtol=2e-4), err

    print("KERNEL_OK")
</pallas_src>

<mosaic_0001>
module attributes {stable_mosaic.version = 11 : i64} {
  func.func @kernel(%arg0: memref<32x128xf32, #tpu.memory_space<vmem>>, %arg1: memref<2x384x128xf32, #tpu.memory_space<vmem>>, %arg2: memref<4x128xf32, #tpu.memory_space<vmem>>, %arg3: memref<32x128xf32, #tpu.memory_space<vmem>>) attributes {dimension_semantics = [], scalar_prefetch = 0 : i64, scratch_operands = 0 : i64, tpu.core_type = #tpu.core_type<tc>} {
    %c0 = arith.constant 0 : index
    %c0_0 = arith.constant 0 : index
    %0 = vector.load %arg0[%c0, %c0_0] : memref<32x128xf32, #tpu.memory_space<vmem>>, vector<32x128xf32>
    %1 = tpu.iota {dimensions = array<i32: 0>} : vector<32x1xi32>
    %c16_i32 = arith.constant 16 : i32
    %c0_i32 = arith.constant 0 : i32
    %2 = arith.cmpi eq, %c16_i32, %c0_i32 : i32
    %c1_i32 = arith.constant 1 : i32
    %3 = arith.select %2, %c1_i32, %c16_i32 : i32
    %4 = vector.broadcast %3 : i32 to vector<32x1xi32>
    %5 = arith.remsi %1, %4 : vector<32x1xi32>
    %c0_i32_1 = arith.constant 0 : i32
    %6 = vector.broadcast %c0_i32_1 : i32 to vector<32x1xi32>
    %7 = arith.cmpi ne, %5, %6 : vector<32x1xi32>
    %c0_i32_2 = arith.constant 0 : i32
    %8 = vector.broadcast %c0_i32_2 : i32 to vector<32x1xi32>
    %9 = arith.cmpi slt, %5, %8 : vector<32x1xi32>
    %c0_i32_3 = arith.constant 0 : i32
    %10 = arith.cmpi slt, %3, %c0_i32_3 : i32
    %11 = vector.broadcast %10 : i1 to vector<32x1xi1>
    %12 = vector.broadcast %11 : vector<32x1xi1> to vector<32x1xi1>
    %13 = arith.xori %9, %12 : vector<32x1xi1>
    %14 = arith.andi %13, %7 : vector<32x1xi1>
    %15 = vector.broadcast %3 : i32 to vector<32x1xi32>
    %16 = arith.addi %5, %15 : vector<32x1xi32>
    %17 = arith.select %14, %16, %5 : vector<32x1xi1>, vector<32x1xi32>
    %c0_i32_4 = arith.constant 0 : i32
    %18 = vector.broadcast %c0_i32_4 : i32 to vector<32x1xi32>
    %19 = arith.cmpi sgt, %17, %18 : vector<32x1xi32>
    %c15_i32 = arith.constant 15 : i32
    %20 = vector.broadcast %c15_i32 : i32 to vector<32x1xi32>
    %21 = arith.cmpi slt, %17, %20 : vector<32x1xi32>
    %c0_5 = arith.constant 0 : index
    %c0_6 = arith.constant 0 : index
    %22 = vector.load %arg2[%c0_5, %c0_6] : memref<4x128xf32, #tpu.memory_space<vmem>>, vector<4x128xf32>
    %c0_7 = arith.constant 0 : index
    %c0_8 = arith.constant 0 : index
    %c0_9 = arith.constant 0 : index
    %23 = vector.load %arg1[%c0_7, %c0_8, %c0_9] : memref<2x384x128xf32, #tpu.memory_space<vmem>>, vector<1x384x128xf32>
    %24 = vector.shape_cast %23 : vector<1x384x128xf32> to vector<384x128xf32>
    %c1_i32_10 = arith.constant 1 : i32
    %25 = tpu.dynamic_rotate %0 by %c1_i32_10 dim 0 : vector<32x128xf32>, i32 -> vector<32x128xf32>
    %cst = arith.constant 0.000000e+00 : f32
    %26 = vector.shape_cast %19 : vector<32x1xi1> to vector<32x1xi1>
    %27 = vector.broadcast %26 : vector<32x1xi1> to vector<32x128xi1>
    %28 = vector.broadcast %cst : f32 to vector<32x128xf32>
    %29 = arith.select %27, %25, %28 : vector<32x128xi1>, vector<32x128xf32>
    %c31_i32 = arith.constant 31 : i32
    %30 = tpu.dynamic_rotate %0 by %c31_i32 dim 0 : vector<32x128xf32>, i32 -> vector<32x128xf32>
    %cst_11 = arith.constant 0.000000e+00 : f32
    %31 = vector.shape_cast %21 : vector<32x1xi1> to vector<32x1xi1>
    %32 = vector.broadcast %31 : vector<32x1xi1> to vector<32x128xi1>
    %33 = vector.broadcast %cst_11 : f32 to vector<32x128xf32>
    %34 = arith.select %32, %30, %33 : vector<32x128xi1>, vector<32x128xf32>
    %35 = tpu.concatenate %29, %0, %34 in 1 : vector<32x128xf32>, vector<32x128xf32>, vector<32x128xf32> -> vector<32x384xf32>
    %cst_12 = arith.constant dense<0.000000e+00> : vector<32x128xf32>
    %36 = tpu.matmul %35, %24, %cst_12 {dimension_numbers = #tpu.dot_dimension_numbers<[1], [0], [0], [1], [0, 0, 1, 1], [], []>} : vector<32x384xf32>, vector<384x128xf32>, vector<32x128xf32> -> vector<32x128xf32>
    %37 = vector.extract_strided_slice %22 {offsets = [0, 0], sizes = [1, 128], strides = [1, 1]} : vector<4x128xf32> to vector<1x128xf32>
    %38 = vector.extract_strided_slice %22 {offsets = [1, 0], sizes = [1, 128], strides = [1, 1]} : vector<4x128xf32> to vector<1x128xf32>
    %cst_13 = arith.constant dense<0.000000e+00> : vector<128xf32>
    %39 = vector.multi_reduction <add>, %36, %cst_13 [0] : vector<32x128xf32> to vector<128xf32>
    %40 = vector.shape_cast %39 : vector<128xf32> to vector<1x128xf32>
    %41 = arith.mulf %36, %36 : vector<32x128xf32>
    %cst_14 = arith.constant dense<0.000000e+00> : vector<128xf32>
    %42 = vector.multi_reduction <add>, %41, %cst_14 [0] : vector<32x128xf32> to vector<128xf32>
    %43 = vector.shape_cast %42 : vector<128xf32> to vector<1x128xf32>
    %44 = tpu.concatenate %40, %43 in 0 : vector<1x128xf32>, vector<1x128xf32> -> vector<2x128xf32>
    %c8_i32 = arith.constant 8 : i32
    %45 = tpu.dynamic_rotate %44 by %c8_i32 dim 1 : vector<2x128xf32>, i32 -> vector<2x128xf32>
    %46 = arith.addf %44, %45 : vector<2x128xf32>
    %c16_i32_15 = arith.constant 16 : i32
    %47 = tpu.dynamic_rotate %46 by %c16_i32_15 dim 1 : vector<2x128xf32>, i32 -> vector<2x128xf32>
    %48 = arith.addf %46, %47 : vector<2x128xf32>
    %c32_i32 = arith.constant 32 : i32
    %49 = tpu.dynamic_rotate %48 by %c32_i32 dim 1 : vector<2x128xf32>, i32 -> vector<2x128xf32>
    %50 = arith.addf %48, %49 : vector<2x128xf32>
    %c64_i32 = arith.constant 64 : i32
    %51 = tpu.dynamic_rotate %50 by %c64_i32 dim 1 : vector<2x128xf32>, i32 -> vector<2x128xf32>
    %52 = arith.addf %50, %51 : vector<2x128xf32>
    %cst_16 = arith.constant 0.001953125 : f32
    %53 = vector.broadcast %cst_16 : f32 to vector<2x128xf32>
    %54 = arith.mulf %52, %53 : vector<2x128xf32>
    %55 = vector.extract_strided_slice %54 {offsets = [0, 0], sizes = [1, 128], strides = [1, 1]} : vector<2x128xf32> to vector<1x128xf32>
    %56 = vector.extract_strided_slice %54 {offsets = [1, 0], sizes = [1, 128], strides = [1, 1]} : vector<2x128xf32> to vector<1x128xf32>
    %57 = arith.mulf %55, %55 : vector<1x128xf32>
    %58 = arith.subf %56, %57 : vector<1x128xf32>
    %cst_17 = arith.constant 9.99999974E-6 : f32
    %59 = vector.broadcast %cst_17 : f32 to vector<1x128xf32>
    %60 = arith.addf %58, %59 : vector<1x128xf32>
    %61 = math.rsqrt %60 : vector<1x128xf32>
    %62 = vector.broadcast %55 : vector<1x128xf32> to vector<32x128xf32>
    %63 = arith.subf %36, %62 : vector<32x128xf32>
    %64 = arith.mulf %61, %37 : vector<1x128xf32>
    %65 = vector.broadcast %64 : vector<1x128xf32> to vector<32x128xf32>
    %66 = arith.mulf %63, %65 : vector<32x128xf32>
    %67 = vector.broadcast %38 : vector<1x128xf32> to vector<32x128xf32>
    %68 = arith.addf %66, %67 : vector<32x128xf32>
    %cst_18 = arith.constant 0.000000e+00 : f32
    %69 = vector.broadcast %cst_18 : f32 to vector<32x128xf32>
    %70 = arith.maximumf %68, %69 : vector<32x128xf32>
    %c1 = arith.constant 1 : index
    %c0_19 = arith.constant 0 : index
    %c0_20 = arith.constant 0 : index
    %71 = vector.load %arg1[%c1, %c0_19, %c0_20] : memref<2x384x128xf32, #tpu.memory_space<vmem>>, vector<1x384x128xf32>
    %72 = vector.shape_cast %71 : vector<1x384x128xf32> to vector<384x128xf32>
    %c1_i32_21 = arith.constant 1 : i32
    %73 = tpu.dynamic_rotate %70 by %c1_i32_21 dim 0 : vector<32x128xf32>, i32 -> vector<32x128xf32>
    %cst_22 = arith.constant 0.000000e+00 : f32
    %74 = vector.shape_cast %19 : vector<32x1xi1> to vector<32x1xi1>
    %75 = vector.broadcast %74 : vector<32x1xi1> to vector<32x128xi1>
    %76 = vector.broadcast %cst_22 : f32 to vector<32x128xf32>
    %77 = arith.select %75, %73, %76 : vector<32x128xi1>, vector<32x128xf32>
    %c31_i32_23 = arith.constant 31 : i32
    %78 = tpu.dynamic_rotate %70 by %c31_i32_23 dim 0 : vector<32x128xf32>, i32 -> vector<32x128xf32>
    %cst_24 = arith.constant 0.000000e+00 : f32
    %79 = vector.shape_cast %21 : vector<32x1xi1> to vector<32x1xi1>
    %80 = vector.broadcast %79 : vector<32x1xi1> to vector<32x128xi1>
    %81 = vector.broadcast %cst_24 : f32 to vector<32x128xf32>
    %82 = arith.select %80, %78, %81 : vector<32x128xi1>, vector<32x128xf32>
    %83 = tpu.concatenate %77, %70, %82 in 1 : vector<32x128xf32>, vector<32x128xf32>, vector<32x128xf32> -> vector<32x384xf32>
    %cst_25 = arith.constant dense<0.000000e+00> : vector<32x128xf32>
    %84 = tpu.matmul %83, %72, %cst_25 {dimension_numbers = #tpu.dot_dimension_numbers<[1], [0], [0], [1], [0, 0, 1, 1], [], []>} : vector<32x384xf32>, vector<384x128xf32>, vector<32x128xf32> -> vector<32x128xf32>
    %85 = vector.extract_strided_slice %22 {offsets = [2, 0], sizes = [1, 128], strides = [1, 1]} : vector<4x128xf32> to vector<1x128xf32>
    %86 = vector.extract_strided_slice %22 {offsets = [3, 0], sizes = [1, 128], strides = [1, 1]} : vector<4x128xf32> to vector<1x128xf32>
    %cst_26 = arith.constant dense<0.000000e+00> : vector<128xf32>
    %87 = vector.multi_reduction <add>, %84, %cst_26 [0] : vector<32x128xf32> to vector<128xf32>
    %88 = vector.shape_cast %87 : vector<128xf32> to vector<1x128xf32>
    %89 = arith.mulf %84, %84 : vector<32x128xf32>
    %cst_27 = arith.constant dense<0.000000e+00> : vector<128xf32>
    %90 = vector.multi_reduction <add>, %89, %cst_27 [0] : vector<32x128xf32> to vector<128xf32>
    %91 = vector.shape_cast %90 : vector<128xf32> to vector<1x128xf32>
    %92 = tpu.concatenate %88, %91 in 0 : vector<1x128xf32>, vector<1x128xf32> -> vector<2x128xf32>
    %c8_i32_28 = arith.constant 8 : i32
    %93 = tpu.dynamic_rotate %92 by %c8_i32_28 dim 1 : vector<2x128xf32>, i32 -> vector<2x128xf32>
    %94 = arith.addf %92, %93 : vector<2x128xf32>
    %c16_i32_29 = arith.constant 16 : i32
    %95 = tpu.dynamic_rotate %94 by %c16_i32_29 dim 1 : vector<2x128xf32>, i32 -> vector<2x128xf32>
    %96 = arith.addf %94, %95 : vector<2x128xf32>
    %c32_i32_30 = arith.constant 32 : i32
    %97 = tpu.dynamic_rotate %96 by %c32_i32_30 dim 1 : vector<2x128xf32>, i32 -> vector<2x128xf32>
    %98 = arith.addf %96, %97 : vector<2x128xf32>
    %c64_i32_31 = arith.constant 64 : i32
    %99 = tpu.dynamic_rotate %98 by %c64_i32_31 dim 1 : vector<2x128xf32>, i32 -> vector<2x128xf32>
    %100 = arith.addf %98, %99 : vector<2x128xf32>
    %cst_32 = arith.constant 0.001953125 : f32
    %101 = vector.broadcast %cst_32 : f32 to vector<2x128xf32>
    %102 = arith.mulf %100, %101 : vector<2x128xf32>
    %103 = vector.extract_strided_slice %102 {offsets = [0, 0], sizes = [1, 128], strides = [1, 1]} : vector<2x128xf32> to vector<1x128xf32>
    %104 = vector.extract_strided_slice %102 {offsets = [1, 0], sizes = [1, 128], strides = [1, 1]} : vector<2x128xf32> to vector<1x128xf32>
    %105 = arith.mulf %103, %103 : vector<1x128xf32>
    %106 = arith.subf %104, %105 : vector<1x128xf32>
    %cst_33 = arith.constant 9.99999974E-6 : f32
    %107 = vector.broadcast %cst_33 : f32 to vector<1x128xf32>
    %108 = arith.addf %106, %107 : vector<1x128xf32>
    %109 = math.rsqrt %108 : vector<1x128xf32>
    %110 = vector.broadcast %103 : vector<1x128xf32> to vector<32x128xf32>
    %111 = arith.subf %84, %110 : vector<32x128xf32>
    %112 = arith.mulf %109, %85 : vector<1x128xf32>
    %113 = vector.broadcast %112 : vector<1x128xf32> to vector<32x128xf32>
    %114 = arith.mulf %111, %113 : vector<32x128xf32>
    %115 = vector.broadcast %86 : vector<1x128xf32> to vector<32x128xf32>
    %116 = arith.addf %114, %115 : vector<32x128xf32>
    %117 = arith.addf %116, %0 : vector<32x128xf32>
    %cst_34 = arith.constant 0.000000e+00 : f32
    %118 = vector.broadcast %cst_34 : f32 to vector<32x128xf32>
    %119 = arith.maximumf %117, %118 : vector<32x128xf32>
    %c0_35 = arith.constant 0 : index
    %c0_36 = arith.constant 0 : index
    %120 = vector.load %arg3[%c0_35, %c0_36] : memref<32x128xf32, #tpu.memory_space<vmem>>, vector<32x128xf32>
    tpu.vector_store %arg3[%c0_35, %c0_36], %119 {strides = array<i32>} : memref<32x128xf32, #tpu.memory_space<vmem>>, vector<32x128xf32>,
    return
  }
}

</mosaic_0001>

<bundles_post_ra>
// kernel: res_encoder.1
= control target key start
LH: loop header
LB: loop body
LE: loop exit
PB: predicated region body
PF: predicated region fallthrough
CT: control target
= control target key end

     0   :  { %v18_v39 = vlaneseq  ;;  %vm362_vm6 = vcmask 1040384   ;;  %s1142_s8 = smov 16   ;;  %s1143_s9 = smov 32   ;;  %s1648_s1 = inlined_call_operand.vmem [shape: f32[2,384,128], index: 1, kind: input, shape index: {}]   ;;  %s1649_s0 = inlined_call_operand.vmem [shape: f32[32,128], index: 0, kind: input, shape index: {}]   ;;  %s1650_s2 = inlined_call_operand.vmem [shape: f32[4,128], index: 2, kind: input, shape index: {}]   ;;  %s1651_s3 = inlined_call_operand.vmem [shape: f32[32,128], index: 3, kind: output, shape index: {}]  }
   0x1   :  { %v96_v0 = vld [vmem:[%s1648_s1 + $0x80] sm:$0xff]  ;;  %v97_v1 = vld [vmem:[%s1648_s1 + $0x88] sm:$0xff]  ;;  %v98_v9 = vld [vmem:[%s1648_s1 + $0x90] sm:$0xff]  ;;  %s1144_s27 = smov 64  }
   0x2   :  { %v80_v2 = vld [vmem:[%s1648_s1] sm:$0xff]  ;;  %v1005_v3 = vpack.c.bf16 %v97_v1, %v96_v0  ;;  %v81_v4 = vld [vmem:[%s1648_s1 + $0x8] sm:$0xff]  ;;  %v99_v10 = vld [vmem:[%s1648_s1 + $0x98] sm:$0xff]  ;;  %v1267_v49 = vshrl.u32 %v18_v39, 7 }
   0x3   :  { %v112_v5 = vld [vmem:[%s1648_s1 + $0x100] sm:$0xff]  ;;  %v113_v6 = vld [vmem:[%s1648_s1 + $0x108] sm:$0xff]  ;;  %v1007_v7 = vpack.c.bf16 %v81_v4, %v80_v2  ;;  %v82_v11 = vld [vmem:[%s1648_s1 + $0x10] sm:$0xff]  ;;  %v1009_v12 = vpack.c.bf16 %v99_v10, %v98_v9 }
   0x4   :  { %v1037_v8 = vpack.c.bf16 %v113_v6, %v112_v5  ;;  %1006 = vmatprep.subr.bf16.mxu0 %v1005_v3  ;;  %v83_v13 = vld [vmem:[%s1648_s1 + $0x18] sm:$0xff]  ;;  %v114_v14 = vld [vmem:[%s1648_s1 + $0x110] sm:$0xff]  ;;  %v100_v18 = vld [vmem:[%s1648_s1 + $0xa0] sm:$0xff]  ;;  %vm153_vm0 = vcmp.lt.s32.totalorder %v1267_v49, 7  ;;  %vm132_vm1 = vcmp.lt.s32.totalorder %v1267_v49, 1 }
   0x5   :  { %v115_v15 = vld [vmem:[%s1648_s1 + $0x118] sm:$0xff]  ;;  %1008 = vmatpush3.bf16.msra.mxu0 %v1007_v7  ;;  %v1011_v16 = vpack.c.bf16 %v83_v13, %v82_v11  ;;  %v101_v19 = vld [vmem:[%s1648_s1 + $0xa8] sm:$0xff]  ;;  %v84_v20 = vld [vmem:[%s1648_s1 + $0x20] sm:$0xff] }
   0x6   :  { %1038 = vmatprep.subr.bf16.mxu1 %v1037_v8  ;;  %v1041_v17 = vpack.c.bf16 %v115_v15, %v114_v14  ;;  %1010 = vmatprep.subr.bf16.mxu0 %v1009_v12  ;;  %v1013_v21 = vpack.c.bf16 %v101_v19, %v100_v18  ;;  %v85_v22 = vld [vmem:[%s1648_s1 + $0x28] sm:$0xff]  ;;  %v116_v23 = vld [vmem:[%s1648_s1 + $0x120] sm:$0xff]  ;;  %v102_v26 = vld [vmem:[%s1648_s1 + $0xb0] sm:$0xff]  ;;  %v20_v14 = vadd.s32 8, %v1267_v49  ;;  %v27_v19 = vand.u32 15, %v1267_v49 }
   0x7   :  { %1040 = vmatpush3.bf16.msra.mxu1 %v1037_v8  ;;  %v117_v24 = vld [vmem:[%s1648_s1 + $0x128] sm:$0xff]  ;;  %v103_v27 = vld [vmem:[%s1648_s1 + $0xb8] sm:$0xff]  ;;  %v118_v28 = vld [vmem:[%s1648_s1 + $0x130] sm:$0xff]  ;;  %v1015_v30 = vpack.c.bf16 %v85_v22, %v84_v20 }
   0x8   :  { %1042 = vmatprep.subr.bf16.mxu1 %v1041_v17  ;;  %v1045_v25 = vpack.c.bf16 %v117_v24, %v116_v23  ;;  %v119_v29 = vld [vmem:[%s1648_s1 + $0x138] sm:$0xff]  ;;  %v1017_v31 = vpack.c.bf16 %v103_v27, %v102_v26  ;;  %v86_v32 = vld [vmem:[%s1648_s1 + $0x30] sm:$0xff]  ;;  %v104_v35 = vld [vmem:[%s1648_s1 + $0xc0] sm:$0xff]  ;;  %v22_v23 = vadd.s32 24, %v1267_v49  ;;  %vm1347_vm2 = vcmp.gt.s32.totalorder %v27_v19, 0 }
   0x9   :  { %1012 = vmatpush3.bf16.msra.mxu0 %v1011_v16  ;;  %v87_v33 = vld [vmem:[%s1648_s1 + $0x38] sm:$0xff]  ;;  %v1049_v34 = vpack.c.bf16 %v119_v29, %v118_v28  ;;  %v105_v36 = vld [vmem:[%s1648_s1 + $0xc8] sm:$0xff]  ;;  %v120_v37 = vld [vmem:[%s1648_s1 + $0x140] sm:$0xff]  ;;  %v21_v28 = vadd.s32 16, %v1267_v49 }
   0xa   :  { %1014 = vmatprep.subr.bf16.mxu0 %v1013_v21  ;;  %v121_v38 = vld [vmem:[%s1648_s1 + $0x148] sm:$0xff]  ;;  %v1019_v40 = vpack.c.bf16 %v87_v33, %v86_v32  ;;  %v1021_v41 = vpack.c.bf16 %v105_v36, %v104_v35  ;;  %v88_v42 = vld [vmem:[%s1648_s1 + $0x40] sm:$0xff]  ;;  %v106_v45 = vld [vmem:[%s1648_s1 + $0xd0] sm:$0xff]  ;;  %v34_v21 = vand.u32 15, %v20_v14 }
   0xb   :  { %1044 = vmatpush3.bf16.msra.mxu1 %v1041_v17  ;;  %v89_v43 = vld [vmem:[%s1648_s1 + $0x48] sm:$0xff]  ;;  %v1053_v44 = vpack.c.bf16 %v121_v38, %v120_v37  ;;  %v107_v46 = vld [vmem:[%s1648_s1 + $0xd8] sm:$0xff]  ;;  %v122_v47 = vld [vmem:[%s1648_s1 + $0x150] sm:$0xff] }
   0xc   :  { %1046 = vmatprep.subr.bf16.mxu1 %v1045_v25  ;;  %v123_v48 = vld [vmem:[%s1648_s1 + $0x158] sm:$0xff]  ;;  %v1023_v50 = vpack.c.bf16 %v89_v43, %v88_v42  ;;  %v1272_v51 = vld [vmem:[%s1649_s0] sm:$0xff]  ;;  %v1025_v52 = vpack.c.bf16 %v107_v46, %v106_v45  ;;  %v90_v53 = vld [vmem:[%s1648_s1 + $0x50] sm:$0xff]  ;;  %vm1355_vm3 = vcmp.lt.s32.totalorder %v34_v21, 15 }
   0xd   :  { %1016 = vmatpush3.bf16.msra.mxu0 %v1015_v30  ;;  %v91_v54 = vld [vmem:[%s1648_s1 + $0x58] sm:$0xff]  ;;  %v1283_v55 = vld [vmem:[%s1649_s0 + $0x8] sm:$0xff]  ;;  %v149_v56 = vrot.slane %v1272_v51, 1  ;;  %v1057_v57 = vpack.c.bf16 %v123_v48, %v122_v47  ;;  %v108_v58 = vld [vmem:[%s1648_s1 + $0xe0] sm:$0xff]  ;;  %234 = vmatprep.mubr.f32.mxu0 %v1272_v51  ;;  %v128_v18 = vrot.slane %v1272_v51, 7 }
   0xe   :  { %1018 = vmatprep.subr.bf16.mxu0 %v1017_v31  ;;  %v109_v59 = vld [vmem:[%s1648_s1 + $0xe8] sm:$0xff]  ;;  %v150_v60 = vrot.slane %v1283_v55, 1  ;;  %v124_v61 = vld [vmem:[%s1648_s1 + $0x160] sm:$0xff]  ;;  %v1027_v63 = vpack.c.bf16 %v91_v54, %v90_v53  ;;  %v110_v5 = vld [vmem:[%s1648_s1 + $0xf0] sm:$0xff]  ;;  %v129_v27 = vrot.slane %v1283_v55, 7  ;;  %v48_v31 = vand.u32 15, %v22_v23 }
   0xf   :  { %1048 = vmatpush3.bf16.msra.mxu1 %v1045_v25  ;;  %v125_v62 = vld [vmem:[%s1648_s1 + $0x168] sm:$0xff]  ;;  %v1029_v1 = vpack.c.bf16 %v109_v59, %v108_v58  ;;  %v92_v2 = vld [vmem:[%s1648_s1 + $0x60] sm:$0xff]  ;;  %v111_v6 = vld [vmem:[%s1648_s1 + $0xf8] sm:$0xff] }
  0x10   :  { %1050 = vmatprep.subr.bf16.mxu1 %v1049_v34  ;;  %v156_v0 = vsel %vm153_vm0, %v149_v56, %v150_v60  ;;  %v93_v3 = vld [vmem:[%s1648_s1 + $0x68] sm:$0xff]  ;;  %v1061_v4 = vpack.c.bf16 %v125_v62, %v124_v61  ;;  %v126_v7 = vld [vmem:[%s1648_s1 + $0x170] sm:$0xff]  ;;  %v127_v8 = vld [vmem:[%s1648_s1 + $0x178] sm:$0xff]  ;;  %v1033_v10 = vpack.c.bf16 %v111_v6, %v110_v5  ;;  %v135_v33 = vsel %vm132_vm1, %v128_v18, %v129_v27 }
  0x11   :  { %1020 = vmatpush3.bf16.msra.mxu0 %v1019_v40  ;;  %961 = vmatprep.mubr.f32.mxu1 %v156_v0  ;;  %v1031_v9 = vpack.c.bf16 %v93_v3, %v92_v2  ;;  %v94_v11 = vld [vmem:[%s1648_s1 + $0x70] sm:$0xff]  ;;  %v95_v12 = vld [vmem:[%s1648_s1 + $0x78] sm:$0xff]  ;;  %v1065_v15 = vpack.c.bf16 %v127_v8, %v126_v7  ;;  %vm1371_vm4 = vcmp.lt.s32.totalorder %v48_v31, 15  ;;  %v765_v31 = vld [vmem:[%s1648_s1 + $0x200] sm:$0xff] }
  0x12   :  { %1022 = vmatprep.subr.bf16.mxu0 %v1021_v41  ;;  %v1332_v13 = vld [vmem:[%s1649_s0 + $0x18] sm:$0xff]  ;;  %v1338_v16 = vld [vmem:[%s1649_s0 + $0x10] sm:$0xff]  ;;  %v1035_v17 = vpack.c.bf16 %v95_v12, %v94_v11  ;;  %s1141_s0 = smov 8  }
  0x13   :  { %1052 = vmatpush3.bf16.msra.mxu1 %v1049_v34  ;;  %v131_v20 = vrot.slane %v1332_v13, 7  ;;  %v151_v22 = vrot.slane %v1338_v16, 1  ;;  %v152_v24 = vrot.slane %v1332_v13, 1  ;;  %v41_v34 = vand.u32 15, %v21_v28 }
  0x14   :  { %1054 = vmatprep.subr.bf16.mxu1 %v1053_v44  ;;  %v130_v35 = vrot.slane %v1338_v16, 7 }
  0x15   :  { %1024 = vmatpush3.bf16.msra.mxu0 %v1023_v50  ;;  %v136_v26 = vsel %vm132_vm1, %v131_v20, %v128_v18  ;;  %v155_v30 = vsel %vm153_vm0, %v150_v60, %v151_v22  ;;  %v154_v32 = vsel %vm153_vm0, %v151_v22, %v152_v24  ;;  %v157_v37 = vsel %vm153_vm0, %v152_v24, %v149_v56 }
  0x16   :  { %1026 = vmatprep.subr.bf16.mxu0 %v1025_v52  ;;  %vm1380_vm5 = vcmp.gt.s32.totalorder %v41_v34, 0  ;;  %v134_v39 = vsel %vm132_vm1, %v129_v27, %v130_v35  ;;  %v133_v40 = vsel %vm132_vm1, %v130_v35, %v131_v20  ;;  %v749_v34 = vld [vmem:[%s1648_s1 + $0x180] sm:$0xff]  ;;  %v750_v35 = vld [vmem:[%s1648_s1 + $0x188] sm:$0xff] }
  0x17   :  { %1056 = vmatpush3.bf16.msra.mxu1 %v1053_v44 }
  0x18   :  { %1058 = vmatprep.subr.bf16.mxu1 %v1057_v57 }
  0x19   :  { %1028 = vmatpush3.bf16.msra.mxu0 %v1027_v63 }
  0x1a   :  { %1030 = vmatprep.subr.bf16.mxu0 %v1029_v1 }
  0x1b   :  { %1060 = vmatpush3.bf16.msra.mxu1 %v1057_v57 }
  0x1c   :  { %1062 = vmatprep.subr.bf16.mxu1 %v1061_v4 }
  0x1d   :  { %1032 = vmatpush3.bf16.msra.mxu0 %v1031_v9 }
  0x1e   :  { %1034 = vmatprep.subr.bf16.mxu0 %v1033_v10 }
  0x1f   :  { %1064 = vmatpush3.bf16.msra.mxu1 %v1061_v4 }
  0x20   :  { %1066 = vmatprep.subr.bf16.mxu1 %v1065_v15 }
  0x21   :  { %1036 = vmatpush3.bf16.msra.mxu0 %v1035_v17 }
  0x23   :  { %1068 = vmatpush3.bf16.msra.mxu1 %v1065_v15 }
  0x24   :  { %745 = vmatmul.mubr.msk.f32.vlgmr.msra.gmra.mrb[0].mxu0 %vm1347_vm2, %v136_v26 }
  0x25   :  { %239 = vmatprep.mubr.f32.mxu0 %v1283_v55 }
  0x26   :  { %962 = vmatmul.mubr.msk.f32.vlgmr.msra.gmra.mrb[0].mxu1 %vm1355_vm3, %v155_v30 }
  0x27   :  { %964 = vmatprep.mubr.f32.mxu1 %v154_v32  ;;  %v766_v32 = vld [vmem:[%s1648_s1 + $0x208] sm:$0xff] }
  0x28   :  { %240 = vmatmul.mubr.f32.gmra.mrb[2].mxu0 %v135_v33  ;;  %v1069_v33 = vpack.c.bf16 %v766_v32, %v765_v31  ;;  %v759_v32 = vld [vmem:[%s1648_s1 + $0x1d0] sm:$0xff] }
  0x29   :  { %244 = vmatprep.mubr.f32.mxu0 %v1338_v16 }
  0x2a   :  { %965 = vmatmul.mubr.msk.f32.gmra.mrb[2].mxu1 %vm1371_vm4, %v157_v37  ;;  %v781_v37 = vld [vmem:[%s1648_s1 + $0x280] sm:$0xff]  ;;  %1070 = vmatprep.subr.bf16.mxu0 %v1069_v33  ;;  %v760_v33 = vld [vmem:[%s1648_s1 + $0x1d8] sm:$0xff] }
  0x2c   :  { %746 = vmatmul.mubr.msk.f32.gmra.mrb[4].mxu0 %vm1380_vm5, %v134_v39  ;;  %v1071_v39 = vpack.c.bf16 %v750_v35, %v749_v34  ;;  %v777_v34 = vld [vmem:[%s1648_s1 + $0x260] sm:$0xff]  ;;  %v778_v35 = vld [vmem:[%s1648_s1 + $0x268] sm:$0xff] }
  0x2d   :  { %249 = vmatprep.mubr.f32.mxu0 %v1332_v13 }
  0x2e   :  { %1072 = vmatpush3.bf16.msra.mxu0 %v1071_v39  ;;  %v1091_v39 = vpack.c.bf16 %v760_v33, %v759_v32 }
  0x30   :  { %250 = vmatmul.mubr.f32.gmra.mrb[6].mxu0 %v133_v40  ;;  %v782_v40 = vld [vmem:[%s1648_s1 + $0x288] sm:$0xff] }
  0xf7   :  { %v833_v41 = vpop.f32.mrb[0].mxu0 }
  0xf8   :  { %v834_v42 = vpop.f32.mrb[1].mxu0 }
  0xf9   :  { %v963_v43 = vpop.f32.mrb[0].mxu1  ;;  %v835_v44 = vadd.f32 %v834_v42, %v833_v41  ;;  %v1101_v41 = vpack.c.bf16 %v782_v40, %v781_v37  ;;  %v767_v42 = vld [vmem:[%s1648_s1 + $0x210] sm:$0xff]  ;;  %v793_v40 = vld [vmem:[%s1648_s1 + $0x2e0] sm:$0xff] }
  0xfa   :  { %v321_v45 = vpop.f32.mrb[1].mxu1 }
  0xfb   :  { %v1393_v46 = vadd.f32 %v835_v44, %v321_v45  ;;  %v836_v47 = vpop.f32.mrb[2].mxu0  ;;  %1102 = vmatprep.subr.bf16.mxu1 %v1101_v41  ;;  %v751_v45 = vld [vmem:[%s1648_s1 + $0x190] sm:$0xff] }
  0xfc   :  { %v837_v48 = vpop.f32.mrb[3].mxu0  ;;  %1104 = vmatpush3.bf16.msra.mxu1 %v1101_v41  ;;  %v794_v41 = vld [vmem:[%s1648_s1 + $0x2e8] sm:$0xff] }
  0xfd   :  { %v966_v50 = vpop.f32.mrb[2].mxu1  ;;  %v838_v52 = vadd.f32 %v837_v48, %v836_v47  ;;  %v349_v63 = vmul.f32 %v1393_v46, %v1393_v46  ;;  %v752_v47 = vld [vmem:[%s1648_s1 + $0x198] sm:$0xff]  ;;  %v783_v48 = vld [vmem:[%s1648_s1 + $0x290] sm:$0xff] }
  0xfe   :  { %v331_v53 = vpop.f32.mrb[3].mxu1 }
  0xff   :  { %v1395_v54 = vadd.f32 %v963_v43, %v838_v52  ;;  %v839_v56 = vpop.f32.mrb[4].mxu0  ;;  %v768_v43 = vld [vmem:[%s1648_s1 + $0x218] sm:$0xff] }
 0x100   :  { %v840_v57 = vpop.f32.mrb[5].mxu0  ;;  %v1073_v44 = vpack.c.bf16 %v768_v43, %v767_v42  ;;  %v784_v52 = vld [vmem:[%s1648_s1 + $0x298] sm:$0xff]  ;;  %v1093_v42 = vpack.c.bf16 %v778_v35, %v777_v34  ;;  %v761_v43 = vld [vmem:[%s1648_s1 + $0x1e0] sm:$0xff] }
 0x101   :  { %v841_v58 = vadd.f32 %v840_v57, %v839_v56  ;;  %v350_v59 = vmul.f32 %v1395_v54, %v1395_v54  ;;  %v340_v0 = vadd.f32 %v1395_v54, %v1393_v46  ;;  %v769_v56 = vld [vmem:[%s1648_s1 + $0x220] sm:$0xff]  ;;  %v770_v57 = vld [vmem:[%s1648_s1 + $0x228] sm:$0xff] }
 0x102   :  { %1074 = vmatprep.subr.bf16.mxu0 %v1073_v44  ;;  %v762_v44 = vld [vmem:[%s1648_s1 + $0x1e8] sm:$0xff] }
 0x103   :  { %v1399_v60 = vadd.f32 %v841_v58, %v331_v53  ;;  %v842_v61 = vpop.f32.mrb[6].mxu0  ;;  %v353_v4 = vadd.f32 %v350_v59, %v349_v63  ;;  %v1105_v53 = vpack.c.bf16 %v784_v52, %v783_v48  ;;  %v1077_v59 = vpack.c.bf16 %v770_v57, %v769_v56  ;;  %v785_v63 = vld [vmem:[%s1648_s1 + $0x2a0] sm:$0xff]  ;;  %v764_v56 = vld [vmem:[%s1648_s1 + $0x1f8] sm:$0xff] }
 0x104   :  { %v843_v62 = vpop.f32.mrb[7].mxu0  ;;  %v1125_v48 = vpack.c.bf16 %v794_v41, %v793_v40 }
 0x105   :  { %v351_v1 = vmul.f32 %v1399_v60, %v1399_v60  ;;  %v844_v2 = vadd.f32 %v843_v62, %v842_v61  ;;  %v341_v3 = vadd.f32 %v340_v0, %v1399_v60  ;;  %1106 = vmatprep.subr.bf16.mxu1 %v1105_v53  ;;  %v753_v61 = vld [vmem:[%s1648_s1 + $0x1a0] sm:$0xff]  ;;  %v754_v62 = vld [vmem:[%s1648_s1 + $0x1a8] sm:$0xff] }
 0x106   :  { %1108 = vmatpush3.bf16.msra.mxu1 %v1105_v53  ;;  %v763_v53 = vld [vmem:[%s1648_s1 + $0x1f0] sm:$0xff] }
 0x107   :  { %v1408_v5 = vadd.f32 %v966_v50, %v844_v2  ;;  %v354_v6 = vadd.f32 %v353_v4, %v351_v1  ;;  %v1075_v50 = vpack.c.bf16 %v752_v47, %v751_v45  ;;  %v1079_v1 = vpack.c.bf16 %v754_v62, %v753_v61  ;;  %v786_v2 = vld [vmem:[%s1648_s1 + $0x2a8] sm:$0xff]  ;;  %v771_v4 = vld [vmem:[%s1648_s1 + $0x230] sm:$0xff]  ;;  %v780_v47 = vld [vmem:[%s1648_s1 + $0x278] sm:$0xff] }
 0x108   :  { %v779_v45 = vld [vmem:[%s1648_s1 + $0x270] sm:$0xff]  ;;  %v1099_v57 = vpack.c.bf16 %v764_v56, %v763_v53 }
 0x109   :  { %v342_v7 = vadd.f32 %v341_v3, %v1408_v5  ;;  %v352_v8 = vmul.f32 %v1408_v5, %v1408_v5  ;;  %1076 = vmatpush3.bf16.msra.mxu0 %v1075_v50  ;;  %v1109_v3 = vpack.c.bf16 %v786_v2, %v785_v63  ;;  %v1095_v50 = vpack.c.bf16 %v762_v44, %v761_v43 }
 0x10a   :  { %1078 = vmatprep.subr.bf16.mxu0 %v1077_v59  ;;  %v1097_v52 = vpack.c.bf16 %v780_v47, %v779_v45  ;;  %v796_v59 = vld [vmem:[%s1648_s1 + $0x2f8] sm:$0xff] }
 0x10b   :  { %v343_v9 = vrot.slane %v342_v7, 4  ;;  %v355_v10 = vadd.f32 %v354_v6, %v352_v8  ;;  %v772_v6 = vld [vmem:[%s1648_s1 + $0x238] sm:$0xff]  ;;  %1110 = vmatprep.subr.bf16.mxu1 %v1109_v3 }
 0x10c   :  { %v1081_v8 = vpack.c.bf16 %v772_v6, %v771_v4  ;;  %1112 = vmatpush3.bf16.msra.mxu1 %v1109_v3 }
 0x10d   :  { %v344_v11 = vadd.f32 %v343_v9, %v342_v7  ;;  %v356_v12 = vrot.slane %v355_v10, 4  ;;  %v755_v7 = vld [vmem:[%s1648_s1 + $0x1b0] sm:$0xff]  ;;  %1080 = vmatpush3.bf16.msra.mxu0 %v1079_v1  ;;  %v756_v9 = vld [vmem:[%s1648_s1 + $0x1b8] sm:$0xff] }
 0x10e   :  { %1082 = vmatprep.subr.bf16.mxu0 %v1081_v8  ;;  %v1570_v8 = vld [vmem:[%s1650_s2] sm:$0xf] }
 0x10f   :  { %v345_v14 = vrot.slane %v344_v11, 2  ;;  %v357_v15 = vadd.f32 %v356_v12, %v355_v10  ;;  %v787_v10 = vld [vmem:[%s1648_s1 + $0x2b0] sm:$0xff]  ;;  %v1083_v12 = vpack.c.bf16 %v756_v9, %v755_v7  ;;  %v386_v7 = vsub.s32 0, %v1267_v49 }
 0x110   :  { %v393_v9 = vrot.slane %v1570_v8, 7 }
 0x111   :  { %v346_v17 = vadd.f32 %v345_v14, %v344_v11  ;;  %v358_v18 = vrot.slane %v357_v15, 2  ;;  %v788_v11 = vld [vmem:[%s1648_s1 + $0x2b8] sm:$0xff]  ;;  %1084 = vmatpush3.bf16.msra.mxu0 %v1083_v12 }
 0x112   :  { %v1113_v14 = vpack.c.bf16 %v788_v11, %v787_v10 }
 0x113   :  { %v347_v19 = vrot.slane %v346_v17, 1  ;;  %v359_v20 = vadd.f32 %v358_v18, %v357_v15  ;;  %v773_v15 = vld [vmem:[%s1648_s1 + $0x240] sm:$0xff] }
 0x114   :  { %v757_v18 = vld [vmem:[%s1648_s1 + $0x1c0] sm:$0xff]  ;;  %1114 = vmatprep.subr.bf16.mxu1 %v1113_v14 }
 0x115   :  { %v360_v21 = vrot.slane %v359_v20, 1  ;;  %v348_v22 = vadd.f32 %v347_v19, %v346_v17  ;;  %v774_v17 = vld [vmem:[%s1648_s1 + $0x248] sm:$0xff]  ;;  %1116 = vmatpush3.bf16.msra.mxu1 %v1113_v14 }
 0x116   :  { %v1085_v19 = vpack.c.bf16 %v774_v17, %v773_v15 }
 0x117   :  { %v361_v23 = vadd.f32 %v360_v21, %v359_v20  ;;  %v758_v20 = vld [vmem:[%s1648_s1 + $0x1c8] sm:$0xff]  ;;  %v789_v21 = vld [vmem:[%s1648_s1 + $0x2c0] sm:$0xff] }
 0x118   :  { %1086 = vmatprep.subr.bf16.mxu0 %v1085_v19 }
 0x119   :  { %v363_v24 = vsel %vm362_vm6, %v348_v22, %v361_v23  ;;  %v790_v22 = vld [vmem:[%s1648_s1 + $0x2c8] sm:$0xff] }
 0x11a   :  { %364 = vrot.lane.b32.xlu0 %v363_v24, %s1141_s0  ;;  %v1117_v23 = vpack.c.bf16 %v790_v22, %v789_v21 }
 0x11c   :  { %1118 = vmatprep.subr.bf16.mxu1 %v1117_v23 }
 0x11d   :  { %1120 = vmatpush3.bf16.msra.mxu1 %v1117_v23 }
 0x18c   :  { %v365_v26 = vpop.permute.xlu0 %364 }
 0x18d   :  { %v366_v27 = vadd.f32 %v365_v26, %v363_v24  ;;  %v775_v24 = vld [vmem:[%s1648_s1 + $0x250] sm:$0xff]  ;;  %v776_v26 = vld [vmem:[%s1648_s1 + $0x258] sm:$0xff] }
 0x18e   :  { %v1089_v31 = vpack.c.bf16 %v776_v26, %v775_v24 }
 0x18f   :  { %367 = vrot.lane.b32.xlu0 %v366_v27, %s1142_s8 }
 0x201   :  { %v368_v28 = vpop.permute.xlu0 %367 }
 0x202   :  { %v369_v30 = vadd.f32 %v368_v28, %v366_v27  ;;  %v1087_v27 = vpack.c.bf16 %v758_v20, %v757_v18  ;;  %v791_v28 = vld [vmem:[%s1648_s1 + $0x2d0] sm:$0xff] }
 0x204   :  { %370 = vrot.lane.b32.xlu1 %v369_v30, %s1143_s9  ;;  %1088 = vmatpush3.bf16.msra.mxu0 %v1087_v27 }
 0x205   :  { %1090 = vmatprep.subr.bf16.mxu0 %v1089_v31 }
 0x208   :  { %1092 = vmatpush3.bf16.msra.mxu0 %v1091_v39 }
 0x209   :  { %1094 = vmatprep.subr.bf16.mxu0 %v1093_v42 }
 0x20c   :  { %1096 = vmatpush3.bf16.msra.mxu0 %v1095_v50 }
 0x20d   :  { %1098 = vmatprep.subr.bf16.mxu0 %v1097_v52 }
 0x210   :  { %1100 = vmatpush3.bf16.msra.mxu0 %v1099_v57 }
 0x276   :  { %v371_v58 = vpop.permute.xlu1 %370 }
 0x277   :  { %v1468_v0 = vadd.f32 %v371_v58, %v369_v30  ;;  %v792_v30 = vld [vmem:[%s1648_s1 + $0x2d8] sm:$0xff]  ;;  %v795_v58 = vld [vmem:[%s1648_s1 + $0x2f0] sm:$0xff] }
 0x278   :  { %v1121_v37 = vpack.c.bf16 %v792_v30, %v791_v28  ;;  %v1129_v61 = vpack.c.bf16 %v796_v59, %v795_v58 }
 0x279   :  { %373 = vrot.lane.b32.xlu1 %v1468_v0, %s1144_s27 }
 0x27a   :  { %1122 = vmatprep.subr.bf16.mxu1 %v1121_v37 }
 0x27b   :  { %1124 = vmatpush3.bf16.msra.mxu1 %v1121_v37 }
 0x27c   :  { %1126 = vmatprep.subr.bf16.mxu1 %v1125_v48 }
 0x27f   :  { %1128 = vmatpush3.bf16.msra.mxu1 %v1125_v48 }
 0x280   :  { %1130 = vmatprep.subr.bf16.mxu1 %v1129_v61 }
 0x283   :  { %1132 = vmatpush3.bf16.msra.mxu1 %v1129_v61 }
 0x2eb   :  { %v374_v62 = vpop.permute.xlu1 %373 }
 0x2ec   :  { %v375_v63 = vadd.f32 %v374_v62, %v1468_v0  ;;  %v1576_v0 = vsub.s32 1, %v1267_v49 }
 0x2ee   :  { %v376_v1 = vmul.f32 0.001953125, %v375_v63  ;;  %v407_v15 = vrot.slane %v1570_v8, %v1576_v0 }
 0x2f0   :  { %v377_v2 = vmul.f32 %v376_v1, %v376_v1  ;;  %v387_v10 = vrot.slane %v376_v1, %v386_v7 }
 0x2f2   :  { %v379_v3 = vrot.slane %v377_v2, 7  ;;  %v389_v14 = vsub.f32 %v1395_v54, %v387_v10  ;;  %v390_v17 = vsub.f32 %v1399_v60, %v387_v10  ;;  %v391_v18 = vsub.f32 %v1408_v5, %v387_v10 }
 0x2f3   :  { %v388_v19 = vsub.f32 %v1393_v46, %v387_v10 }
 0x2f4   :  { %v381_v4 = vsub.f32 %v376_v1, %v379_v3 }
 0x2f6   :  { %v382_v6 = vadd.f32 1e-05, %v381_v4 }
 0x2f8   :  { %1137 = vrsqrt.f32 %v382_v6 }
 0x302   :  { %v1138_v11 = vpop.eup %1137 }
 0x303   :  { %v395_v12 = vmul.f32 %v1138_v11, %v393_v9 }
 0x305   :  { %v399_v20 = vrot.slane %v395_v12, %v1576_v0 }
 0x307   :  { %v400_v21 = vmul.f32 %v399_v20, %v388_v19  ;;  %v403_v22 = vmul.f32 %v399_v20, %v391_v18  ;;  %v401_v23 = vmul.f32 %v399_v20, %v389_v14  ;;  %v402_v24 = vmul.f32 %v399_v20, %v390_v17 }
 0x309   :  { %v408_v26 = vadd.f32 %v407_v15, %v400_v21  ;;  %v411_v27 = vadd.f32 %v407_v15, %v403_v22  ;;  %v409_v28 = vadd.f32 %v407_v15, %v401_v23  ;;  %v410_v30 = vadd.f32 %v407_v15, %v402_v24 }
 0x30b   :  { %v412_v54 = vmax.f32 %v408_v26, 0.0  ;;  %v415_v31 = vmax.f32 %v411_v27, 0.0  ;;  %v413_v32 = vmax.f32 %v409_v28, 0.0  ;;  %v414_v33 = vmax.f32 %v410_v30, 0.0 }
 0x30d   :  { %v465_v34 = vrot.slane %v412_v54, 7  ;;  %553 = vmatprep.mubr.f32.mxu0 %v412_v54  ;;  %v468_v60 = vrot.slane %v415_v31, 7  ;;  %v477_v5 = vrot.slane %v412_v54, 1  ;;  %v478_v35 = vrot.slane %v413_v32, 1 }
 0x30e   :  { %v479_v46 = vrot.slane %v414_v33, 1  ;;  %v480_v37 = vrot.slane %v415_v31, 1  ;;  %v466_v41 = vrot.slane %v413_v32, 7  ;;  %v467_v45 = vrot.slane %v414_v33, 7 }
 0x30f   :  { %v472_v39 = vsel %vm132_vm1, %v468_v60, %v465_v34  ;;  %v483_v40 = vsel %vm153_vm0, %v477_v5, %v478_v35 }
 0x310   :  { %797 = vmatmul.mubr.msk.f32.vlgmr.msra.gmra.mrb[8].mxu0 %vm1347_vm2, %v472_v39  ;;  %999 = vmatprep.mubr.f32.mxu1 %v483_v40  ;;  %v482_v42 = vsel %vm153_vm0, %v478_v35, %v479_v46  ;;  %v481_v43 = vsel %vm153_vm0, %v479_v46, %v480_v37  ;;  %v471_v44 = vsel %vm132_vm1, %v465_v34, %v466_v41 }
 0x311   :  { %558 = vmatprep.mubr.f32.mxu0 %v413_v32  ;;  %1000 = vmatmul.mubr.msk.f32.vlgmr.msra.gmra.mrb[4].mxu1 %vm1355_vm3, %v482_v42  ;;  %v484_v25 = vsel %vm153_vm0, %v480_v37, %v477_v5  ;;  %v470_v29 = vsel %vm132_vm1, %v466_v41, %v467_v45  ;;  %v469_v47 = vsel %vm132_vm1, %v467_v45, %v468_v60 }
 0x312   :  { %1002 = vmatprep.mubr.f32.mxu1 %v481_v43 }
 0x314   :  { %559 = vmatmul.mubr.f32.gmra.mrb[10].mxu0 %v471_v44 }
 0x315   :  { %563 = vmatprep.mubr.f32.mxu0 %v414_v33  ;;  %1003 = vmatmul.mubr.msk.f32.gmra.mrb[6].mxu1 %vm1371_vm4, %v484_v25 }
 0x318   :  { %798 = vmatmul.mubr.msk.f32.gmra.mrb[12].mxu0 %vm1380_vm5, %v470_v29 }
 0x319   :  { %568 = vmatprep.mubr.f32.mxu0 %v415_v31 }
 0x31c   :  { %569 = vmatmul.mubr.f32.gmra.mrb[14].mxu0 %v469_v47 }
 0x3e3   :  { %v897_v48 = vpop.f32.mrb[8].mxu0 }
 0x3e4   :  { %v898_v50 = vpop.f32.mrb[9].mxu0  ;;  %v1001_v52 = vpop.f32.mrb[4].mxu1 }
 0x3e5   :  { %v899_v53 = vadd.f32 %v898_v50, %v897_v48  ;;  %v640_v56 = vpop.f32.mrb[5].mxu1  ;;  %v710_v48 = vrot.slane %v1570_v8, 1  ;;  %v723_v50 = vsub.s32 3, %v1267_v49 }
 0x3e7   :  { %v1609_v57 = vadd.f32 %v899_v53, %v640_v56  ;;  %v900_v36 = vpop.f32.mrb[10].mxu0 }
 0x3e8   :  { %v901_v58 = vpop.f32.mrb[11].mxu0  ;;  %v1004_v59 = vpop.f32.mrb[6].mxu1 }
 0x3e9   :  { %v902_v61 = vadd.f32 %v901_v58, %v900_v36  ;;  %v650_v62 = vpop.f32.mrb[7].mxu1  ;;  %v668_v10 = vmul.f32 %v1609_v57, %v1609_v57  ;;  %v724_v36 = vrot.slane %v1570_v8, %v723_v50 }
 0x3eb   :  { %v1611_v63 = vadd.f32 %v1001_v52, %v902_v61  ;;  %v903_v38 = vpop.f32.mrb[12].mxu0 }
 0x3ec   :  { %v904_v1 = vpop.f32.mrb[13].mxu0 }
 0x3ed   :  { %v905_v2 = vadd.f32 %v904_v1, %v903_v38  ;;  %v669_v3 = vmul.f32 %v1611_v63, %v1611_v63  ;;  %v659_v11 = vadd.f32 %v1611_v63, %v1609_v57 }
 0x3ef   :  { %v651_v4 = vadd.f32 %v905_v2, %v650_v62  ;;  %v906_v6 = vpop.f32.mrb[14].mxu0  ;;  %v672_v15 = vadd.f32 %v669_v3, %v668_v10 }
 0x3f0   :  { %v907_v9 = vpop.f32.mrb[15].mxu0 }
 0x3f1   :  { %v670_v12 = vmul.f32 %v651_v4, %v651_v4  ;;  %v908_v14 = vadd.f32 %v907_v9, %v906_v6  ;;  %v660_v17 = vadd.f32 %v659_v11, %v651_v4 }
 0x3f3   :  { %v656_v18 = vadd.f32 %v1004_v59, %v908_v14  ;;  %v673_v19 = vadd.f32 %v672_v15, %v670_v12 }
 0x3f5   :  { %v661_v20 = vadd.f32 %v660_v17, %v656_v18  ;;  %v671_v21 = vmul.f32 %v656_v18, %v656_v18 }
 0x3f7   :  { %v662_v22 = vrot.slane %v661_v20, 4  ;;  %v674_v23 = vadd.f32 %v673_v19, %v671_v21 }
 0x3f9   :  { %v663_v24 = vadd.f32 %v662_v22, %v661_v20  ;;  %v675_v26 = vrot.slane %v674_v23, 4 }
 0x3fb   :  { %v664_v27 = vrot.slane %v663_v24, 2  ;;  %v676_v28 = vadd.f32 %v675_v26, %v674_v23 }
 0x3fd   :  { %v665_v30 = vadd.f32 %v664_v27, %v663_v24  ;;  %v677_v54 = vrot.slane %v676_v28, 2 }
 0x3ff   :  { %v666_v31 = vrot.slane %v665_v30, 1  ;;  %v678_v32 = vadd.f32 %v677_v54, %v676_v28 }
 0x401   :  { %v679_v33 = vrot.slane %v678_v32, 1  ;;  %v667_v34 = vadd.f32 %v666_v31, %v665_v30 }
 0x403   :  { %v680_v60 = vadd.f32 %v679_v33, %v678_v32 }
 0x405   :  { %v681_v5 = vsel %vm362_vm6, %v667_v34, %v680_v60 }
 0x406   :  { %682 = vrot.lane.b32.xlu0 %v681_v5, %s1141_s0 }
 0x478   :  { %v683_v35 = vpop.permute.xlu0 %682 }
 0x479   :  { %v684_v46 = vadd.f32 %v683_v35, %v681_v5 }
 0x47b   :  { %685 = vrot.lane.b32.xlu1 %v684_v46, %s1142_s8 }
 0x4ed   :  { %v686_v37 = vpop.permute.xlu1 %685 }
 0x4ee   :  { %v687_v39 = vadd.f32 %v686_v37, %v684_v46 }
 0x4f0   :  { %688 = vrot.lane.b32.xlu0 %v687_v39, %s1143_s9 }
 0x562   :  { %v689_v40 = vpop.permute.xlu0 %688 }
 0x563   :  { %v690_v41 = vadd.f32 %v689_v40, %v687_v39 }
 0x565   :  { %691 = vrot.lane.b32.xlu1 %v690_v41, %s1144_s27 }
 0x5d7   :  { %v692_v42 = vpop.permute.xlu1 %691 }
 0x5d8   :  { %v693_v43 = vadd.f32 %v692_v42, %v690_v41 }
 0x5da   :  { %v694_v44 = vmul.f32 0.001953125, %v693_v43 }
 0x5dc   :  { %v695_v45 = vmul.f32 %v694_v44, %v694_v44  ;;  %v705_v52 = vrot.slane %v694_v44, %v386_v7 }
 0x5de   :  { %v697_v25 = vrot.slane %v695_v45, 7  ;;  %v706_v58 = vsub.f32 %v1609_v57, %v705_v52  ;;  %v707_v59 = vsub.f32 %v1611_v63, %v705_v52  ;;  %v708_v61 = vsub.f32 %v651_v4, %v705_v52 }
 0x5df   :  { %v709_v62 = vsub.f32 %v656_v18, %v705_v52 }
 0x5e0   :  { %v699_v29 = vsub.f32 %v694_v44, %v697_v25 }
 0x5e2   :  { %v700_v47 = vadd.f32 1e-05, %v699_v29 }
 0x5e4   :  { %1139 = vrsqrt.f32 %v700_v47 }
 0x5ee   :  { %v1140_v53 = vpop.eup %1139 }
 0x5ef   :  { %v712_v56 = vmul.f32 %v1140_v53, %v710_v48 }
 0x5f1   :  { %v716_v38 = vrot.slane %v712_v56, %v1576_v0 }
 0x5f3   :  { %v717_v1 = vmul.f32 %v716_v38, %v706_v58  ;;  %v718_v2 = vmul.f32 %v716_v38, %v707_v59  ;;  %v719_v3 = vmul.f32 %v716_v38, %v708_v61  ;;  %v720_v6 = vmul.f32 %v716_v38, %v709_v62 }
 0x5f5   :  { %v725_v9 = vadd.f32 %v724_v36, %v717_v1  ;;  %v726_v10 = vadd.f32 %v724_v36, %v718_v2  ;;  %v727_v49 = vadd.f32 %v724_v36, %v719_v3  ;;  %v728_v7 = vadd.f32 %v724_v36, %v720_v6 }
 0x5f7   :  { %v729_v11 = vadd.f32 %v725_v9, %v1272_v51  ;;  %v730_v8 = vadd.f32 %v726_v10, %v1283_v55  ;;  %v731_v57 = vadd.f32 %v727_v49, %v1338_v16  ;;  %v732_v63 = vadd.f32 %v728_v7, %v1332_v13 }
 0x5f9   :  { %v733_v4 = vmax.f32 %v729_v11, 0.0  ;;  %v734_v12 = vmax.f32 %v730_v8, 0.0  ;;  %v735_v14 = vmax.f32 %v731_v57, 0.0  ;;  %v736_v0 = vmax.f32 %v732_v63, 0.0 }
 0x5fb   :  { %737 = vst [vmem:[%s1651_s3] sm:$0xff] %v733_v4  ;;  %738 = vst [vmem:[%s1651_s3 + $0x8] sm:$0xff] %v734_v12 }
 0x5fc   :  { %739 = vst [vmem:[%s1651_s3 + $0x10] sm:$0xff] %v735_v14  ;;  %740 = vst [vmem:[%s1651_s3 + $0x18] sm:$0xff] %v736_v0 }

</bundles_post_ra>
